<compile_context>
chip_gen: v6e
topology: v6e:2x2x1
jax: 0.10.0
libtpu: 0.0.40
codegen_flags: <defaults>
</compile_context>

<pallas_src>
import jax
import jax.numpy as jnp
from jax.experimental import pallas as pl
from jax.experimental.pallas import tpu as pltpu


def _round_up(n, m):
    return pl.cdiv(n, m) * m


def autoencoder_kernel(
    x_ref,
    w1_ref, b1_ref,   # Linear(input_shape, 32)
    w2_ref, b2_ref,   # Linear(32, 16)
    w3_ref, b3_ref,   # Linear(16, lower_shape)
    w4_ref, b4_ref,   # Linear(lower_shape, 16)
    w5_ref, b5_ref,   # Linear(16, 32)
    w6_ref, b6_ref,   # Linear(32, input_shape)
    o_ref,
):
    def dense(h, w_ref, b_ref):
        # bf16 MXU inputs, f32 accumulation, f32 bias add.
        return jnp.dot(h.astype(jnp.bfloat16), w_ref[...],
                       preferred_element_type=jnp.float32) + b_ref[...]

    h = x_ref[...]                                    # bf16 tile straight from HBM

    # ---- encoder ----
    h = jnp.maximum(dense(h, w1_ref, b1_ref), 0.0)    # ReLU
    h = jnp.maximum(dense(h, w2_ref, b2_ref), 0.0)    # ReLU
    h = jnp.tanh(dense(h, w3_ref, b3_ref))            # Tanh

    # ---- decoder ----
    h = jnp.maximum(dense(h, w4_ref, b4_ref), 0.0)    # ReLU
    h = jnp.maximum(dense(h, w5_ref, b5_ref), 0.0)    # ReLU
    z = dense(h, w6_ref, b6_ref)
    # Sigmoid = 1 / (1 + exp(-z)); exp on EUP, divide via approx EUP reciprocal.
    h = pl.reciprocal(1.0 + jnp.exp(-z), approx=True)

    o_ref[...] = h.astype(o_ref.dtype)


def autoencoder_forward(x, params, *, tile_b=2048):
    """x: (batch, input_shape) f32. params: list of (W_t (in,out) f32, b (out,) f32)."""
    batch, input_shape = x.shape

    # Stream the input as bf16 (it is cast to bf16 before the first matmul
    # anyway); halves the kernel's HBM read bytes.
    x_bf = x.astype(jnp.bfloat16)

    # Batch tile: large (amortizes ~0.35us/step overhead), multiple of 8
    # (sublane), never larger than the sublane-rounded batch, and -- when the
    # batch allows it -- small enough for >= 2 grid steps so the "parallel"
    # axis can shard across v7x's two TensorCores.
    tile_b = _round_up(max(8, min(tile_b, _round_up(batch, 8))), 8)
    if batch >= 16 and pl.cdiv(batch, tile_b) < 2:
        tile_b = _round_up(pl.cdiv(batch, 2), 8)
    grid = (pl.cdiv(batch, tile_b),)   # ragged last tile: reads padded, writes masked

    # Weights in bf16 (MXU inputs), biases as f32 row vectors.  No feature-dim
    # padding: block dims equal to the full array dims are legal, and keeping
    # the real (small) widths avoids extra HBM pad/slice copies and halves the
    # bytes the kernel DMAs per row.
    flat = []
    for w_t, b in params:
        flat.append(w_t.astype(jnp.bfloat16))
        flat.append(b.astype(jnp.float32).reshape(1, -1))

    x_spec = pl.BlockSpec((tile_b, input_shape), lambda i: (i, 0))
    o_spec = pl.BlockSpec((tile_b, input_shape), lambda i: (i, 0))
    # Full-array blocks with constant index_maps -> fetched once, VMEM-resident.
    wb_specs = [pl.BlockSpec(a.shape, lambda i: (0, 0)) for a in flat]

    out = pl.pallas_call(
        autoencoder_kernel,
        out_shape=jax.ShapeDtypeStruct((batch, input_shape), jnp.float32),
        grid=grid,
        in_specs=[x_spec] + wb_specs,
        out_specs=o_spec,
        compiler_params=pltpu.CompilerParams(
            dimension_semantics=("parallel",)),
    )(x_bf, *flat)

    return out


def init_linear(key, in_features, out_features):
    """PyTorch-style uniform(-1/sqrt(in), 1/sqrt(in)) init.

    Returns (W_t, b): W_t has shape (in, out) (pre-transposed), b has shape (out,).
    """
    kw, kb = jax.random.split(key)
    bound = 1.0 / jnp.sqrt(jnp.float32(in_features))
    w = jax.random.uniform(kw, (out_features, in_features), jnp.float32,
                           minval=-bound, maxval=bound)
    b = jax.random.uniform(kb, (out_features,), jnp.float32,
                           minval=-bound, maxval=bound)
    return w.T, b


def make_params(key, input_shape, lower_shape):
    dims = [
        (input_shape, 32), (32, 16), (16, lower_shape),   # encoder
        (lower_shape, 16), (16, 32), (32, input_shape),   # decoder
    ]
    keys = jax.random.split(key, len(dims))
    return [init_linear(k, d_in, d_out) for k, (d_in, d_out) in zip(keys, dims)]


def reference_forward(x, params):
    """Plain-JAX f32 reference for sanity checking."""
    h = x
    acts = [jax.nn.relu, jax.nn.relu, jnp.tanh,
            jax.nn.relu, jax.nn.relu, jax.nn.sigmoid]
    for (w_t, b), act in zip(params, acts):
        h = act(h @ w_t + b[None, :])
    return h


if __name__ == "__main__":
    input_shape = 64
    lower_shape = 8

    key = jax.random.PRNGKey(0)
    k_x, k_x2, k_p = jax.random.split(key, 3)
    params = make_params(k_p, input_shape, lower_shape)

    # --- main check: small batch, single grid step ---
    batch = 8
    x = jax.random.normal(k_x, (batch, input_shape), jnp.float32)
    out = jax.block_until_ready(autoencoder_forward(x, params))
    ref = reference_forward(x, params)
    assert out.shape == (batch, input_shape), out.shape
    # bf16 MXU inputs (f32 accumulation) -> loosened tolerance vs f32 reference.
    assert jnp.allclose(out, ref, atol=2e-2, rtol=2e-2), "mismatch vs reference"

    # --- multi-step grid + ragged last tile check (batch not a tile multiple) ---
    batch2 = 20
    x2 = jax.random.normal(k_x2, (batch2, input_shape), jnp.float32)
    out2 = jax.block_until_ready(autoencoder_forward(x2, params, tile_b=8))
    ref2 = reference_forward(x2, params)
    assert out2.shape == (batch2, input_shape), out2.shape
    assert jnp.allclose(out2, ref2, atol=2e-2, rtol=2e-2), "ragged-tile mismatch"

    print("KERNEL_OK")
</pallas_src>

<mosaic_0001>
module attributes {stable_mosaic.version = 11 : i64} {
  func.func @autoencoder_kernel(%arg0: i32, %arg1: memref<8x64xbf16, #tpu.memory_space<vmem>>, %arg2: memref<64x32xbf16, #tpu.memory_space<vmem>>, %arg3: memref<1x32xf32, #tpu.memory_space<vmem>>, %arg4: memref<32x16xbf16, #tpu.memory_space<vmem>>, %arg5: memref<1x16xf32, #tpu.memory_space<vmem>>, %arg6: memref<16x8xbf16, #tpu.memory_space<vmem>>, %arg7: memref<1x8xf32, #tpu.memory_space<vmem>>, %arg8: memref<8x16xbf16, #tpu.memory_space<vmem>>, %arg9: memref<1x16xf32, #tpu.memory_space<vmem>>, %arg10: memref<16x32xbf16, #tpu.memory_space<vmem>>, %arg11: memref<1x32xf32, #tpu.memory_space<vmem>>, %arg12: memref<32x64xbf16, #tpu.memory_space<vmem>>, %arg13: memref<1x64xf32, #tpu.memory_space<vmem>>, %arg14: memref<8x64xf32, #tpu.memory_space<vmem>>) attributes {dimension_semantics = [#tpu.dimension_semantics<parallel>], iteration_bounds = array<i64: 1>, scalar_prefetch = 0 : i64, scratch_operands = 0 : i64, tpu.core_type = #tpu.core_type<tc>, window_params = [{transform_indices = @transform_0, window_bounds = array<i64: 8, 64>}, {pipeline_mode = #tpu.pipeline_mode<synchronous>, transform_indices = @transform_1, window_bounds = array<i64: 64, 32>}, {pipeline_mode = #tpu.pipeline_mode<synchronous>, transform_indices = @transform_2, window_bounds = array<i64: 1, 32>}, {pipeline_mode = #tpu.pipeline_mode<synchronous>, transform_indices = @transform_3, window_bounds = array<i64: 32, 16>}, {pipeline_mode = #tpu.pipeline_mode<synchronous>, transform_indices = @transform_4, window_bounds = array<i64: 1, 16>}, {pipeline_mode = #tpu.pipeline_mode<synchronous>, transform_indices = @transform_5, window_bounds = array<i64: 16, 8>}, {pipeline_mode = #tpu.pipeline_mode<synchronous>, transform_indices = @transform_6, window_bounds = array<i64: 1, 8>}, {pipeline_mode = #tpu.pipeline_mode<synchronous>, transform_indices = @transform_7, window_bounds = array<i64: 8, 16>}, {pipeline_mode = #tpu.pipeline_mode<synchronous>, transform_indices = @transform_8, window_bounds = array<i64: 1, 16>}, {pipeline_mode = #tpu.pipeline_mode<synchronous>, transform_indices = @transform_9, window_bounds = array<i64: 16, 32>}, {pipeline_mode = #tpu.pipeline_mode<synchronous>, transform_indices = @transform_10, window_bounds = array<i64: 1, 32>}, {pipeline_mode = #tpu.pipeline_mode<synchronous>, transform_indices = @transform_11, window_bounds = array<i64: 32, 64>}, {pipeline_mode = #tpu.pipeline_mode<synchronous>, transform_indices = @transform_12, window_bounds = array<i64: 1, 64>}, {transform_indices = @transform_13, window_bounds = array<i64: 8, 64>}]} {
    %c0 = arith.constant 0 : index
    %c0_0 = arith.constant 0 : index
    %0 = vector.load %arg1[%c0, %c0_0] : memref<8x64xbf16, #tpu.memory_space<vmem>>, vector<8x64xbf16>
    %c0_1 = arith.constant 0 : index
    %c0_2 = arith.constant 0 : index
    %1 = vector.load %arg2[%c0_1, %c0_2] : memref<64x32xbf16, #tpu.memory_space<vmem>>, vector<64x32xbf16>
    %cst = arith.constant dense<0.000000e+00> : vector<8x32xf32>
    %2 = tpu.matmul %0, %1, %cst {dimension_numbers = #tpu.dot_dimension_numbers<[1], [0], [0], [1], [0, 0, 1, 1], [], []>} : vector<8x64xbf16>, vector<64x32xbf16>, vector<8x32xf32> -> vector<8x32xf32>
    %c0_3 = arith.constant 0 : index
    %c0_4 = arith.constant 0 : index
    %3 = vector.load %arg3[%c0_3, %c0_4] : memref<1x32xf32, #tpu.memory_space<vmem>>, vector<1x32xf32>
    %4 = vector.broadcast %3 : vector<1x32xf32> to vector<8x32xf32>
    %5 = arith.addf %2, %4 : vector<8x32xf32>
    %cst_5 = arith.constant 0.000000e+00 : f32
    %6 = vector.broadcast %cst_5 : f32 to vector<8x32xf32>
    %7 = arith.maximumf %5, %6 : vector<8x32xf32>
    %8 = arith.truncf %7 : vector<8x32xf32> to vector<8x32xbf16>
    %c0_6 = arith.constant 0 : index
    %c0_7 = arith.constant 0 : index
    %9 = vector.load %arg4[%c0_6, %c0_7] : memref<32x16xbf16, #tpu.memory_space<vmem>>, vector<32x16xbf16>
    %cst_8 = arith.constant dense<0.000000e+00> : vector<8x16xf32>
    %10 = tpu.matmul %8, %9, %cst_8 {dimension_numbers = #tpu.dot_dimension_numbers<[1], [0], [0], [1], [0, 0, 1, 1], [], []>} : vector<8x32xbf16>, vector<32x16xbf16>, vector<8x16xf32> -> vector<8x16xf32>
    %c0_9 = arith.constant 0 : index
    %c0_10 = arith.constant 0 : index
    %11 = vector.load %arg5[%c0_9, %c0_10] : memref<1x16xf32, #tpu.memory_space<vmem>>, vector<1x16xf32>
    %12 = vector.broadcast %11 : vector<1x16xf32> to vector<8x16xf32>
    %13 = arith.addf %10, %12 : vector<8x16xf32>
    %cst_11 = arith.constant 0.000000e+00 : f32
    %14 = vector.broadcast %cst_11 : f32 to vector<8x16xf32>
    %15 = arith.maximumf %13, %14 : vector<8x16xf32>
    %16 = arith.truncf %15 : vector<8x16xf32> to vector<8x16xbf16>
    %c0_12 = arith.constant 0 : index
    %c0_13 = arith.constant 0 : index
    %17 = vector.load %arg6[%c0_12, %c0_13] : memref<16x8xbf16, #tpu.memory_space<vmem>>, vector<16x8xbf16>
    %cst_14 = arith.constant dense<0.000000e+00> : vector<8x8xf32>
    %18 = tpu.matmul %16, %17, %cst_14 {dimension_numbers = #tpu.dot_dimension_numbers<[1], [0], [0], [1], [0, 0, 1, 1], [], []>} : vector<8x16xbf16>, vector<16x8xbf16>, vector<8x8xf32> -> vector<8x8xf32>
    %c0_15 = arith.constant 0 : index
    %c0_16 = arith.constant 0 : index
    %19 = vector.load %arg7[%c0_15, %c0_16] : memref<1x8xf32, #tpu.memory_space<vmem>>, vector<1x8xf32>
    %20 = vector.broadcast %19 : vector<1x8xf32> to vector<8x8xf32>
    %21 = arith.addf %18, %20 : vector<8x8xf32>
    %22 = math.tanh %21 : vector<8x8xf32>
    %23 = arith.truncf %22 : vector<8x8xf32> to vector<8x8xbf16>
    %c0_17 = arith.constant 0 : index
    %c0_18 = arith.constant 0 : index
    %24 = vector.load %arg8[%c0_17, %c0_18] : memref<8x16xbf16, #tpu.memory_space<vmem>>, vector<8x16xbf16>
    %cst_19 = arith.constant dense<0.000000e+00> : vector<8x16xf32>
    %25 = tpu.matmul %23, %24, %cst_19 {dimension_numbers = #tpu.dot_dimension_numbers<[1], [0], [0], [1], [0, 0, 1, 1], [], []>} : vector<8x8xbf16>, vector<8x16xbf16>, vector<8x16xf32> -> vector<8x16xf32>
    %c0_20 = arith.constant 0 : index
    %c0_21 = arith.constant 0 : index
    %26 = vector.load %arg9[%c0_20, %c0_21] : memref<1x16xf32, #tpu.memory_space<vmem>>, vector<1x16xf32>
    %27 = vector.broadcast %26 : vector<1x16xf32> to vector<8x16xf32>
    %28 = arith.addf %25, %27 : vector<8x16xf32>
    %cst_22 = arith.constant 0.000000e+00 : f32
    %29 = vector.broadcast %cst_22 : f32 to vector<8x16xf32>
    %30 = arith.maximumf %28, %29 : vector<8x16xf32>
    %31 = arith.truncf %30 : vector<8x16xf32> to vector<8x16xbf16>
    %c0_23 = arith.constant 0 : index
    %c0_24 = arith.constant 0 : index
    %32 = vector.load %arg10[%c0_23, %c0_24] : memref<16x32xbf16, #tpu.memory_space<vmem>>, vector<16x32xbf16>
    %cst_25 = arith.constant dense<0.000000e+00> : vector<8x32xf32>
    %33 = tpu.matmul %31, %32, %cst_25 {dimension_numbers = #tpu.dot_dimension_numbers<[1], [0], [0], [1], [0, 0, 1, 1], [], []>} : vector<8x16xbf16>, vector<16x32xbf16>, vector<8x32xf32> -> vector<8x32xf32>
    %c0_26 = arith.constant 0 : index
    %c0_27 = arith.constant 0 : index
    %34 = vector.load %arg11[%c0_26, %c0_27] : memref<1x32xf32, #tpu.memory_space<vmem>>, vector<1x32xf32>
    %35 = vector.broadcast %34 : vector<1x32xf32> to vector<8x32xf32>
    %36 = arith.addf %33, %35 : vector<8x32xf32>
    %cst_28 = arith.constant 0.000000e+00 : f32
    %37 = vector.broadcast %cst_28 : f32 to vector<8x32xf32>
    %38 = arith.maximumf %36, %37 : vector<8x32xf32>
    %39 = arith.truncf %38 : vector<8x32xf32> to vector<8x32xbf16>
    %c0_29 = arith.constant 0 : index
    %c0_30 = arith.constant 0 : index
    %40 = vector.load %arg12[%c0_29, %c0_30] : memref<32x64xbf16, #tpu.memory_space<vmem>>, vector<32x64xbf16>
    %cst_31 = arith.constant dense<0.000000e+00> : vector<8x64xf32>
    %41 = tpu.matmul %39, %40, %cst_31 {dimension_numbers = #tpu.dot_dimension_numbers<[1], [0], [0], [1], [0, 0, 1, 1], [], []>} : vector<8x32xbf16>, vector<32x64xbf16>, vector<8x64xf32> -> vector<8x64xf32>
    %c0_32 = arith.constant 0 : index
    %c0_33 = arith.constant 0 : index
    %42 = vector.load %arg13[%c0_32, %c0_33] : memref<1x64xf32, #tpu.memory_space<vmem>>, vector<1x64xf32>
    %43 = vector.broadcast %42 : vector<1x64xf32> to vector<8x64xf32>
    %44 = arith.addf %41, %43 : vector<8x64xf32>
    %cst_34 = arith.constant 0.000000e+00 : f32
    %45 = vector.broadcast %cst_34 : f32 to vector<8x64xf32>
    %46 = arith.subf %45, %44 : vector<8x64xf32>
    %47 = math.exp %46 : vector<8x64xf32>
    %cst_35 = arith.constant 1.000000e+00 : f32
    %48 = vector.broadcast %cst_35 : f32 to vector<8x64xf32>
    %49 = arith.addf %48, %47 : vector<8x64xf32>
    %50 = tpu.reciprocal %49 {approx = true} : vector<8x64xf32> -> vector<8x64xf32>
    %c0_36 = arith.constant 0 : index
    %c0_37 = arith.constant 0 : index
    %51 = vector.load %arg14[%c0_36, %c0_37] : memref<8x64xf32, #tpu.memory_space<vmem>>, vector<8x64xf32>
    tpu.vector_store %arg14[%c0_36, %c0_37], %50 {strides = array<i32>} : memref<8x64xf32, #tpu.memory_space<vmem>>, vector<8x64xf32>,
    return
  }
  func.func @transform_0(%arg0: i32) -> (i32, i32) {
    %c0_i32 = arith.constant 0 : i32
    %c0_i32_0 = arith.constant 0 : i32
    return %arg0, %c0_i32 : i32, i32
  }
  func.func @transform_1(%arg0: i32) -> (i32, i32) {
    %c0_i32 = arith.constant 0 : i32
    %c0_i32_0 = arith.constant 0 : i32
    %c0_i32_1 = arith.constant 0 : i32
    return %c0_i32, %c0_i32_0 : i32, i32
  }
  func.func @transform_2(%arg0: i32) -> (i32, i32) {
    %c0_i32 = arith.constant 0 : i32
    %c0_i32_0 = arith.constant 0 : i32
    %c0_i32_1 = arith.constant 0 : i32
    return %c0_i32, %c0_i32_0 : i32, i32
  }
  func.func @transform_3(%arg0: i32) -> (i32, i32) {
    %c0_i32 = arith.constant 0 : i32
    %c0_i32_0 = arith.constant 0 : i32
    %c0_i32_1 = arith.constant 0 : i32
    return %c0_i32, %c0_i32_0 : i32, i32
  }
  func.func @transform_4(%arg0: i32) -> (i32, i32) {
    %c0_i32 = arith.constant 0 : i32
    %c0_i32_0 = arith.constant 0 : i32
    %c0_i32_1 = arith.constant 0 : i32
    return %c0_i32, %c0_i32_0 : i32, i32
  }
  func.func @transform_5(%arg0: i32) -> (i32, i32) {
    %c0_i32 = arith.constant 0 : i32
    %c0_i32_0 = arith.constant 0 : i32
    %c0_i32_1 = arith.constant 0 : i32
    return %c0_i32, %c0_i32_0 : i32, i32
  }
  func.func @transform_6(%arg0: i32) -> (i32, i32) {
    %c0_i32 = arith.constant 0 : i32
    %c0_i32_0 = arith.constant 0 : i32
    %c0_i32_1 = arith.constant 0 : i32
    return %c0_i32, %c0_i32_0 : i32, i32
  }
  func.func @transform_7(%arg0: i32) -> (i32, i32) {
    %c0_i32 = arith.constant 0 : i32
    %c0_i32_0 = arith.constant 0 : i32
    %c0_i32_1 = arith.constant 0 : i32
    return %c0_i32, %c0_i32_0 : i32, i32
  }
  func.func @transform_8(%arg0: i32) -> (i32, i32) {
    %c0_i32 = arith.constant 0 : i32
    %c0_i32_0 = arith.constant 0 : i32
    %c0_i32_1 = arith.constant 0 : i32
    return %c0_i32, %c0_i32_0 : i32, i32
  }
  func.func @transform_9(%arg0: i32) -> (i32, i32) {
    %c0_i32 = arith.constant 0 : i32
    %c0_i32_0 = arith.constant 0 : i32
    %c0_i32_1 = arith.constant 0 : i32
    return %c0_i32, %c0_i32_0 : i32, i32
  }
  func.func @transform_10(%arg0: i32) -> (i32, i32) {
    %c0_i32 = arith.constant 0 : i32
    %c0_i32_0 = arith.constant 0 : i32
    %c0_i32_1 = arith.constant 0 : i32
    return %c0_i32, %c0_i32_0 : i32, i32
  }
  func.func @transform_11(%arg0: i32) -> (i32, i32) {
    %c0_i32 = arith.constant 0 : i32
    %c0_i32_0 = arith.constant 0 : i32
    %c0_i32_1 = arith.constant 0 : i32
    return %c0_i32, %c0_i32_0 : i32, i32
  }
  func.func @transform_12(%arg0: i32) -> (i32, i32) {
    %c0_i32 = arith.constant 0 : i32
    %c0_i32_0 = arith.constant 0 : i32
    %c0_i32_1 = arith.constant 0 : i32
    return %c0_i32, %c0_i32_0 : i32, i32
  }
  func.func @transform_13(%arg0: i32) -> (i32, i32) {
    %c0_i32 = arith.constant 0 : i32
    %c0_i32_0 = arith.constant 0 : i32
    return %arg0, %c0_i32 : i32, i32
  }
}

</mosaic_0001>

<bundles_post_ra>
// kernel: tpu_custom_call.1
= control target key start
LH: loop header
LB: loop body
LE: loop exit
PB: predicated region body
PF: predicated region fallthrough
CT: control target
= control target key end

     0   :  { %v592_v1 = vmov 0.0   ;;  %vm593_vm0 = vmmov 0   ;;  %s751_s0 = inlined_call_operand.vmem [shape: bf16[8,64], index: 0, kind: input, shape index: {}]   ;;  %s752_s1 = inlined_call_operand.vmem [shape: bf16[64,32], index: 1, kind: input, shape index: {}]   ;;  %s753_s2 = inlined_call_operand.vmem [shape: f32[1,32], index: 2, kind: input, shape index: {}]   ;;  %s754_s3 = inlined_call_operand.vmem [shape: bf16[32,16], index: 3, kind: input, shape index: {}]   ;;  %s755_s4 = inlined_call_operand.vmem [shape: f32[1,16], index: 4, kind: input, shape index: {}]   ;;  %s756_s5 = inlined_call_operand.vmem [shape: bf16[16,8], index: 5, kind: input, shape index: {}]   ;;  %s757_s6 = inlined_call_operand.vmem [shape: f32[1,8], index: 6, kind: input, shape index: {}]   ;;  %s758_s7 = inlined_call_operand.vmem [shape: bf16[8,16], index: 7, kind: input, shape index: {}]   ;;  %s759_s8 = inlined_call_operand.vmem [shape: f32[1,16], index: 8, kind: input, shape index: {}]   ;;  %s760_s9 = inlined_call_operand.vmem [shape: bf16[16,32], index: 9, kind: input, shape index: {}]   ;;  %s761_s10 = inlined_call_operand.vmem [shape: f32[1,32], index: 10, kind: input, shape index: {}]   ;;  %s762_s11 = inlined_call_operand.vmem [shape: bf16[32,64], index: 11, kind: input, shape index: {}]   ;;  %s763_s12 = inlined_call_operand.vmem [shape: f32[1,64], index: 12, kind: input, shape index: {}]   ;;  %s764_s13 = inlined_call_operand.hbm [shape: f32[8,64], index: 13, kind: output, shape index: {}]  }
   0x1   :  { %v554_v0 = vld [vmem:[%s752_s1 + $0x18] sm:$0xff]   ;;  %505 = vmatprep.subr.bf16.mxu0 %v592_v1  ;;  %517 = vmatprep.subr.bf16.mxu1 %v592_v1  ;;  %v555_v2 = vld [vmem:[%s752_s1 + $0x10] sm:$0xff]   ;;  %v556_v3 = vld [vmem:[%s752_s1 + $0x8] sm:$0xff]  }
   0x2   :  { %506 = vmatpush3.bf16.msra.mxu0 %v554_v0  ;;  %513 = vmatprep.mubr.msk.bf16.mxu0 %vm593_vm0, %v592_v1 }
   0x3   :  { %507 = vmatprep.subr.bf16.mxu0 %v592_v1  ;;  %521 = vmatprep.mubr.msk.bf16.mxu1 %vm593_vm0, %v592_v1 }
   0x6   :  { %508 = vmatpush3.bf16.msra.mxu0 %v555_v2 }
   0x7   :  { %509 = vmatprep.subr.bf16.mxu0 %v592_v1 }
   0x8   :  { %18 = vsyncpa [#allocation3], 0  ;;  %v557_v4 = vld [vmem:[%s752_s1] sm:$0xff]   ;;  %vm86_vm1 = vcmask 523264   ;;  %v558_v6 = vld [vmem:[%s754_s3 + $0x8] sm:$0xff]   ;;  %vm155_vm2 = vcmask 261120  }
   0x9   :  { %v46_v5 = vld [vmem:[%s751_s0] sm:$0xf]  ;;  %518 = vmatpush3.bf16.msra.mxu1 %v558_v6  ;;  %vm216_vm3 = vcmask 130048   ;;  %vm274_vm4 = vcmask 1043456   ;;  %vm270_vm5 = vcmask 64512   ;;  %v562_v36 = vld [vmem:[%s762_s11 + $0x8] sm:$0xff]  }
   0xa   :  { %510 = vmatpush3.bf16.msra.mxu0 %v556_v3  ;;  %519 = vmatprep.subr.bf16.mxu1 %v592_v1  ;;  %v559_v7 = vld [vmem:[%s754_s3] sm:$0xff]  }
   0xb   :  { %511 = vmatprep.subr.bf16.mxu0 %v592_v1  ;;  %v466_v8 = vld [vmem:[%s753_s2] ss:$0 sm:$0xff] }
   0xc   :  { %v560_v14 = vld [vmem:[%s756_s5] sm:$0xff]  }
   0xd   :  { %520 = vmatpush3.bf16.msra.mxu1 %v559_v7  ;;  %v472_v17 = vld [vmem:[%s755_s4] ss:$0 sm:$0xff] }
   0xe   :  { %512 = vmatpush3.bf16.msra.mxu0 %v557_v4  ;;  %525 = vmatprep.subr.bf16.mxu1 %v592_v1  ;;  %v262_v25 = vld [vmem:[%s758_s7] sm:$0xf] }
   0xf   :  { %531 = vmatprep.subr.bf16.mxu0 %v592_v1  ;;  %v276_v26 = vsel %vm274_vm4, %v262_v25, 0  ;;  %v561_v27 = vld [vmem:[%s760_s9] sm:$0xff]  }
  0x10   :  { %v476_v28 = vld [vmem:[%s757_s6] ss:$0 sm:$0xff] }
  0x11   :  { %514 = vmatmul.mubr.msk.bf16.vlgmr.msra.gmra.mxu0 %vm86_vm1, %v46_v5  ;;  %v479_v37 = vld [vmem:[%s759_s8] ss:$0 sm:$0xff] }
  0x12   :  { %533 = vmatprep.mubr.msk.bf16.mxu0 %vm593_vm0, %v592_v1  ;;  %532 = vmatpush3.bf16.msra.mxu0 %v276_v26  ;;  %v563_v45 = vld [vmem:[%s762_s11] sm:$0xff]  }
  0x13   :  { %543 = vmatprep.subr.bf16.mxu0 %v592_v1  ;;  %v481_v46 = vld [vmem:[%s761_s10] ss:$0 sm:$0xff]  ;;  %s594_s10 = smov [#allocation2]  }
  0x14   :  { %v484_v54 = vld [vmem:[%s763_s12] ss:$0 sm:$0xff]  ;;  %s458_s11 = sshll.u32 %s594_s10, 4  ;;  %s459_s11 = int_to_ptr.vmem [resolvable:$true] %s458_s11 }
  0x15   :  { %s570_s17 = scalar_lea.vmem %s459_s11, 128  ;;  %p575_p1 = scmp.lt.s32.totalorder %s459_s11, %s459_s11 }
  0x16   :  { %p571_p0 = scmp.ne.s32.totalorder %s459_s11, %s570_s17  ;;  %p576_p2 = scmp.lt.s32.totalorder %s570_s17, %s570_s17 }
  0x18   :  { %p577_p3 = por %p576_p2, %p575_p1 }
  0x1a   :  { %p578_p4 = pnand %p577_p3, %p571_p0 }
  0xd1   :  { %v124_v9 = vpop.f32.mrf.mxu0 }
  0xd2   :  { %v125_v10 = vadd.f32 %v466_v8, %v124_v9 }
  0xd3   :  { %v515_v11 = vpop.f32.mrf.mxu0 }
  0xd4   :  { %v130_v12 = vmax.f32 %v125_v10, 0.0 }
  0xd5   :  { %v127_v13 = vpop.f32.mrf.mxu0 }
  0xd6   :  { %v131_v15 = vpack.c.bf16 %v130_v12, %v130_v12 }
  0xd7   :  { %v516_v16 = vpop.f32.mrf.mxu0 }
  0xd8   :  { %522 = vmatmul.mubr.msk.bf16.vlgmr.msra.gmra.mxu1 %vm155_vm2, %v131_v15 }
  0xd9   :  { %526 = vmatpush3.bf16.msra.mxu1 %v560_v14  ;;  %527 = vmatprep.mubr.msk.bf16.mxu1 %vm593_vm0, %v592_v1 }
  0xda   :  { %537 = vmatprep.subr.bf16.mxu1 %v592_v1 }
 0x198   :  { %v193_v18 = vpop.f32.mrf.mxu1 }
 0x199   :  { %v194_v19 = vadd.f32 %v472_v17, %v193_v18 }
 0x19a   :  { %v523_v20 = vpop.f32.mrf.mxu1 }
 0x19b   :  { %v199_v21 = vmax.f32 %v194_v19, 0.0 }
 0x19c   :  { %v196_v22 = vpop.f32.mrf.mxu1 }
 0x19d   :  { %v200_v23 = vpack.c.bf16 %v199_v21, %v199_v21 }
 0x19e   :  { %v524_v24 = vpop.f32.mrf.mxu1 }
 0x19f   :  { %528 = vmatmul.mubr.msk.bf16.vlgmr.msra.gmra.mxu1 %vm216_vm3, %v200_v23 }
 0x1a0   :  { %539 = vmatprep.mubr.msk.bf16.mxu1 %vm593_vm0, %v592_v1  ;;  %538 = vmatpush3.bf16.msra.mxu1 %v561_v27 }
 0x25f   :  { %v254_v29 = vpop.f32.mrf.mxu1 }
 0x260   :  { %v255_v30 = vadd.f32 %v476_v28, %v254_v29 }
 0x261   :  { %v529_v31 = vpop.f32.mrf.mxu1 }
 0x262   :  { %564 = vtanh.f32 %v255_v30 }
 0x263   :  { %v257_v32 = vpop.f32.mrf.mxu1 }
 0x265   :  { %v530_v33 = vpop.f32.mrf.mxu1 }
 0x26f   :  { %v565_v34 = vpop.eup %564 }
 0x270   :  { %v261_v35 = vpack.c.bf16 %v565_v34, %v565_v34 }
 0x272   :  { %534 = vmatmul.mubr.msk.bf16.vlgmr.msra.gmra.mxu0 %vm270_vm5, %v261_v35 }
 0x273   :  { %547 = vmatprep.mubr.msk.bf16.mxu0 %vm593_vm0, %v592_v1  ;;  %544 = vmatpush3.bf16.msra.mxu0 %v562_v36 }
 0x274   :  { %545 = vmatprep.subr.bf16.mxu0 %v592_v1 }
 0x277   :  { %546 = vmatpush3.bf16.msra.mxu0 %v563_v45 }
 0x332   :  { %v312_v38 = vpop.f32.mrf.mxu0 }
 0x333   :  { %v313_v39 = vadd.f32 %v479_v37, %v312_v38 }
 0x334   :  { %v535_v40 = vpop.f32.mrf.mxu0 }
 0x335   :  { %v318_v41 = vmax.f32 %v313_v39, 0.0 }
 0x336   :  { %v315_v42 = vpop.f32.mrf.mxu0 }
 0x337   :  { %v319_v43 = vpack.c.bf16 %v318_v41, %v318_v41 }
 0x338   :  { %v536_v44 = vpop.f32.mrf.mxu0 }
 0x339   :  { %540 = vmatmul.mubr.msk.bf16.vlgmr.msra.gmra.mxu1 %vm216_vm3, %v319_v43 }
 0x3f9   :  { %v372_v47 = vpop.f32.mrf.mxu1 }
 0x3fa   :  { %v373_v48 = vadd.f32 %v481_v46, %v372_v47 }
 0x3fb   :  { %v541_v49 = vpop.f32.mrf.mxu1 }
 0x3fc   :  { %v378_v50 = vmax.f32 %v373_v48, 0.0 }
 0x3fd   :  { %v375_v51 = vpop.f32.mrf.mxu1 }
 0x3fe   :  { %v379_v52 = vpack.c.bf16 %v378_v50, %v378_v50 }
 0x3ff   :  { %v542_v53 = vpop.f32.mrf.mxu1 }
 0x400   :  { %548 = vmatmul.mubr.msk.bf16.vlgmr.msra.gmra.mxu0 %vm155_vm2, %v379_v52 }
 0x4c0   :  { %v440_v55 = vpop.f32.mrf.mxu0 }
 0x4c1   :  { %v441_v56 = vadd.f32 %v484_v54, %v440_v55 }
 0x4c2   :  { %v549_v57 = vpop.f32.mrf.mxu0 }
 0x4c3   :  { %v446_v58 = vsub.f32 0.0, %v441_v56 }
 0x4c4   :  { %v443_v59 = vpop.f32.mrf.mxu0 }
 0x4c5   :  { %v447_v60 = vmul.f32 1.442695, %v446_v58 }
 0x4c6   :  { %v550_v61 = vpop.f32.mrf.mxu0 }
 0x4c7   :  { %566 = vpow2.f32 %v447_v60 }
 0x4d4   :  { %v567_v62 = vpop.eup %566 }
 0x4d5   :  { %v449_v63 = vadd.f32 1.0, %v567_v62 }
 0x4d7   :  { %568 = vrcp.f32 %v449_v63 }
 0x4e4   :  { %v569_v0 = vpop.eup %568 }
 0x4e5   :  { %451 = vst.msk [vmem:[#allocation2] sm:$0xff] %vm86_vm1, %v569_v0 }
 0x4e6   :  { %581 = shalt.err (!%p578_p4)
}
 0x4e7   :  { %461 = dma.vmem_to_hbm [thread:$0]  %s459_s11, 128, %s764_s13, [#allocation3]  }
 0x4e8   :  { %590 = dma.done.wait [#allocation3], 128  }
 0x4e9   :  { %591 = vsyncadd [#allocation3], 4294967168 }
 0x4ea   :  { %465 = vsyncpa [#allocation3], 1 }

</bundles_post_ra>
